<compile_context>
chip_gen: v6e
topology: v6e:2x2x1
jax: 0.10.0
libtpu: 0.0.40
codegen_flags: <defaults>
</compile_context>

<pallas_src>
import functools
import math

import numpy as np
import jax
import jax.numpy as jnp
from jax import lax
from jax.experimental import pallas as pl
from jax.experimental.pallas import tpu as pltpu


# torch concat slot -> lexicographic parity index (4*h_par + 2*w_par + t_par)
#   x0=(0,0,0) x1=(1,0,0) x2=(0,1,0) x3=(0,0,1)
#   x4=(1,1,0) x5=(0,1,1) x6=(1,0,1) x7=(1,1,1)
_SLOT_TO_LEX = np.array([0, 4, 2, 1, 6, 3, 5, 7])
# lexicographic parity index -> torch concat slot  (== [0, 3, 2, 5, 1, 6, 4, 7])
_LEX_TO_SLOT = np.argsort(_SLOT_TO_LEX)


def _merge_norm_linear_kernel(x_ref, g_ref, b_ref, w_ref, o_ref, *, eps):
    """Octant de-interleave + LayerNorm(8C) + Linear(8C->out) on one row tile.

    x_ref : (bh, 2, Wp, 2, Tp, 2C)   contiguous slab of the input view
    g_ref : (4, 2C)  f32             LayerNorm weight, parity-major order
    b_ref : (4, 2C)  f32             LayerNorm bias,   parity-major order
    w_ref : (4, 2C, out_dim)  bf16   Linear weight (pre-transposed/permuted)
    o_ref : (bh*Wp*Tp, out_dim)      merged-token rows for this grid step
    """
    bh, _, nwp, _, ntp, c2 = x_ref.shape
    rows = bh * nwp * ntp
    inv_k = 1.0 / (4 * c2)                       # 1 / (8*C)

    # De-interleave the 4 (h,w)-parity groups; t parity already sits in lanes.
    # Everything below is VMEM-resident: HBM was touched exactly once by the
    # block DMA of x_ref.
    parts = []
    for ph in (0, 1):
        for pw in (0, 1):
            p = x_ref[:, ph, :, pw, :, :]        # (bh, Wp, Tp, 2C)
            parts.append(p.reshape(rows, c2).astype(jnp.float32))

    # One-pass LayerNorm moments over all 8C channels.
    s = parts[0].sum(axis=-1, keepdims=True)
    ss = (parts[0] * parts[0]).sum(axis=-1, keepdims=True)
    for p in parts[1:]:
        s = s + p.sum(axis=-1, keepdims=True)
        ss = ss + (p * p).sum(axis=-1, keepdims=True)
    mu = s * inv_k
    var = jnp.maximum(ss * inv_k - mu * mu, 0.0)
    inv = lax.rsqrt(var + eps)                   # EUP rsqrt

    # Normalize + affine per parity group, accumulate the reduction matmul.
    # Operands are bf16 (MXU-native), accumulation stays f32.
    acc = jnp.zeros(o_ref.shape, jnp.float32)
    for idx, p in enumerate(parts):
        y = (p - mu) * inv * g_ref[idx] + b_ref[idx]
        acc = acc + jnp.dot(y.astype(w_ref.dtype), w_ref[idx],
                            preferred_element_type=jnp.float32)
    o_ref[...] = acc.astype(o_ref.dtype)


def patch_merging_forward(x, H, W, T, gamma, beta, weight, *, eps=1e-5,
                          row_tile=1024, mxu_dtype=jnp.bfloat16):
    """Equivalent of PatchMerging.forward(x, H, W, T).

    x:      (B, H*W*T, C)
    gamma:  (8C,)           LayerNorm weight
    beta:   (8C,)           LayerNorm bias
    weight: (out_dim, 8C)   Linear weight (bias=False), out_dim = 8//rf * C
    returns (B, H/2*W/2*T/2, out_dim)
    """
    B, L, C = x.shape
    assert L == H * W * T, "input feature has wrong size"
    assert H % 2 == 0 and W % 2 == 0 and T % 2 == 0, "spatial dims must be even"
    K = 8 * C
    out_dim = weight.shape[0]
    assert weight.shape == (out_dim, K)

    Hp, Wp, Tp = H // 2, W // 2, T // 2
    L2 = Hp * Wp * Tp
    n_rows = B * L2
    total_h = B * Hp                 # h-pair rows (grid unit along dim 0)
    per_h = Wp * Tp                  # merged tokens produced per h-pair row

    # Free (bitcast) reshape: parity dims exposed, t parity folded into lanes.
    # No HBM copy of the activations happens before the kernel.
    xr = x.reshape(total_h, 2, Wp, 2, Tp, 2 * C)

    # Permute / pre-cast the tiny parameters once at trace time into the
    # kernel's parity-major channel order (lex = 4*ph + 2*pw + pt).
    gamma_p = gamma.reshape(8, C)[_LEX_TO_SLOT].reshape(4, 2 * C).astype(jnp.float32)
    beta_p = beta.reshape(8, C)[_LEX_TO_SLOT].reshape(4, 2 * C).astype(jnp.float32)
    w_p = (jnp.transpose(weight).reshape(8, C, out_dim)[_LEX_TO_SLOT]
           .reshape(4, 2 * C, out_dim).astype(mxu_dtype))

    # Row tiling: bh h-pair rows per grid step -> rows_per_step merged tokens.
    # rows_per_step must be a multiple of 8 unless one step covers all rows.
    m = 8 // math.gcd(8, per_h)
    bh = max(m, (max(row_tile, per_h) // per_h) // m * m)
    bh = min(bh, total_h)
    if bh >= total_h and total_h > m:
        # keep >= 2 grid steps so the "parallel" axis can feed both cores (v7x)
        half = (total_h + 1) // 2
        bh = min(total_h, ((half + m - 1) // m) * m)
    rows_per_step = bh * per_h
    grid_steps = (total_h + bh - 1) // bh

    kernel = functools.partial(_merge_norm_linear_kernel, eps=eps)
    out = pl.pallas_call(
        kernel,
        out_shape=jax.ShapeDtypeStruct((n_rows, out_dim), x.dtype),
        grid=(grid_steps,),
        in_specs=[
            pl.BlockSpec((bh, 2, Wp, 2, Tp, 2 * C),
                         lambda i: (i, 0, 0, 0, 0, 0)),              # x slab
            pl.BlockSpec((4, 2 * C), lambda i: (0, 0)),              # gamma
            pl.BlockSpec((4, 2 * C), lambda i: (0, 0)),              # beta
            pl.BlockSpec((4, 2 * C, out_dim), lambda i: (0, 0, 0)),  # weight
        ],
        out_specs=pl.BlockSpec((rows_per_step, out_dim), lambda i: (i, 0)),
        compiler_params=pltpu.CompilerParams(
            dimension_semantics=("parallel",),
            vmem_limit_bytes=64 * 1024 * 1024,
        ),
    )(xr, gamma_p, beta_p, w_p)

    return out.reshape(B, L2, out_dim)


def _reference_numpy(x, H, W, T, gamma, beta, weight, eps=1e-5):
    """Pure-numpy transcription of the PyTorch forward (for verification)."""
    B, L, C = x.shape
    xr = x.reshape(B, H, W, T, C)
    x0 = xr[:, 0::2, 0::2, 0::2, :]
    x1 = xr[:, 1::2, 0::2, 0::2, :]
    x2 = xr[:, 0::2, 1::2, 0::2, :]
    x3 = xr[:, 0::2, 0::2, 1::2, :]
    x4 = xr[:, 1::2, 1::2, 0::2, :]
    x5 = xr[:, 0::2, 1::2, 1::2, :]
    x6 = xr[:, 1::2, 0::2, 1::2, :]
    x7 = xr[:, 1::2, 1::2, 1::2, :]
    xc = np.concatenate([x0, x1, x2, x3, x4, x5, x6, x7], -1)
    xc = xc.reshape(B, -1, 8 * C).astype(np.float32)
    mu = xc.mean(-1, keepdims=True)
    var = ((xc - mu) ** 2).mean(-1, keepdims=True)
    xn = (xc - mu) / np.sqrt(var + eps)
    y = xn * gamma + beta
    return (y @ weight.T).astype(x.dtype)


if __name__ == "__main__":
    key = jax.random.PRNGKey(0)
    # dim=32, reduce_factor=2  ->  out_dim = 4*32 = 128 (lane-dense output)
    B, H, W, T, C = 2, 4, 4, 16, 32
    reduce_factor = 2
    out_dim = 8 // reduce_factor * C

    k1, k2, k3, k4 = jax.random.split(key, 4)
    x = jax.random.normal(k1, (B, H * W * T, C), dtype=jnp.float32)
    gamma = 1.0 + 0.1 * jax.random.normal(k2, (8 * C,), dtype=jnp.float32)
    beta = 0.1 * jax.random.normal(k3, (8 * C,), dtype=jnp.float32)
    weight = 0.05 * jax.random.normal(k4, (out_dim, 8 * C), dtype=jnp.float32)

    out = patch_merging_forward(x, H, W, T, gamma, beta, weight)
    out = jax.block_until_ready(out)

    ref = _reference_numpy(np.asarray(x), H, W, T, np.asarray(gamma),
                           np.asarray(beta), np.asarray(weight))
    assert out.shape == ref.shape, (out.shape, ref.shape)
    # bf16 MXU operands (f32 accumulation) vs an f32 reference.
    np.testing.assert_allclose(np.asarray(out), ref, rtol=2e-2, atol=2e-2)

    print("KERNEL_OK")
</pallas_src>

<mosaic_0001>
module attributes {stable_mosaic.version = 11 : i64} {
  func.func @_merge_norm_linear_kernel(%arg0: i32, %arg1: memref<2x2x2x2x8x64xf32, #tpu.memory_space<vmem>>, %arg2: memref<4x64xf32, #tpu.memory_space<vmem>>, %arg3: memref<4x64xf32, #tpu.memory_space<vmem>>, %arg4: memref<4x64x128xbf16, #tpu.memory_space<vmem>>, %arg5: memref<32x128xf32, #tpu.memory_space<vmem>>) attributes {dimension_semantics = [#tpu.dimension_semantics<parallel>], iteration_bounds = array<i64: 2>, scalar_prefetch = 0 : i64, scratch_operands = 0 : i64, tpu.core_type = #tpu.core_type<tc>, window_params = [{transform_indices = @transform_0, window_bounds = array<i64: 2, 2, 2, 2, 8, 64>}, {pipeline_mode = #tpu.pipeline_mode<synchronous>, transform_indices = @transform_1, window_bounds = array<i64: 4, 64>}, {pipeline_mode = #tpu.pipeline_mode<synchronous>, transform_indices = @transform_2, window_bounds = array<i64: 4, 64>}, {pipeline_mode = #tpu.pipeline_mode<synchronous>, transform_indices = @transform_3, window_bounds = array<i64: 4, 64, 128>}, {transform_indices = @transform_4, window_bounds = array<i64: 32, 128>}]} {
    %c0 = arith.constant 0 : index
    %c0_0 = arith.constant 0 : index
    %c0_1 = arith.constant 0 : index
    %c0_2 = arith.constant 0 : index
    %c0_3 = arith.constant 0 : index
    %c0_4 = arith.constant 0 : index
    %0 = vector.load %arg1[%c0, %c0_0, %c0_1, %c0_2, %c0_3, %c0_4] : memref<2x2x2x2x8x64xf32, #tpu.memory_space<vmem>>, vector<2x1x2x1x8x64xf32>
    %1 = vector.shape_cast %0 : vector<2x1x2x1x8x64xf32> to vector<2x2x8x64xf32>
    %2 = vector.shape_cast %1 : vector<2x2x8x64xf32> to vector<32x64xf32>
    %c0_5 = arith.constant 0 : index
    %c0_6 = arith.constant 0 : index
    %c0_7 = arith.constant 0 : index
    %c1 = arith.constant 1 : index
    %c0_8 = arith.constant 0 : index
    %c0_9 = arith.constant 0 : index
    %3 = vector.load %arg1[%c0_5, %c0_6, %c0_7, %c1, %c0_8, %c0_9] : memref<2x2x2x2x8x64xf32, #tpu.memory_space<vmem>>, vector<2x1x2x1x8x64xf32>
    %4 = vector.shape_cast %3 : vector<2x1x2x1x8x64xf32> to vector<2x2x8x64xf32>
    %5 = vector.shape_cast %4 : vector<2x2x8x64xf32> to vector<32x64xf32>
    %c0_10 = arith.constant 0 : index
    %c1_11 = arith.constant 1 : index
    %c0_12 = arith.constant 0 : index
    %c0_13 = arith.constant 0 : index
    %c0_14 = arith.constant 0 : index
    %c0_15 = arith.constant 0 : index
    %6 = vector.load %arg1[%c0_10, %c1_11, %c0_12, %c0_13, %c0_14, %c0_15] : memref<2x2x2x2x8x64xf32, #tpu.memory_space<vmem>>, vector<2x1x2x1x8x64xf32>
    %7 = vector.shape_cast %6 : vector<2x1x2x1x8x64xf32> to vector<2x2x8x64xf32>
    %8 = vector.shape_cast %7 : vector<2x2x8x64xf32> to vector<32x64xf32>
    %c0_16 = arith.constant 0 : index
    %c1_17 = arith.constant 1 : index
    %c0_18 = arith.constant 0 : index
    %c1_19 = arith.constant 1 : index
    %c0_20 = arith.constant 0 : index
    %c0_21 = arith.constant 0 : index
    %9 = vector.load %arg1[%c0_16, %c1_17, %c0_18, %c1_19, %c0_20, %c0_21] : memref<2x2x2x2x8x64xf32, #tpu.memory_space<vmem>>, vector<2x1x2x1x8x64xf32>
    %10 = vector.shape_cast %9 : vector<2x1x2x1x8x64xf32> to vector<2x2x8x64xf32>
    %11 = vector.shape_cast %10 : vector<2x2x8x64xf32> to vector<32x64xf32>
    %cst = arith.constant dense<0.000000e+00> : vector<32xf32>
    %12 = vector.multi_reduction <add>, %2, %cst [1] : vector<32x64xf32> to vector<32xf32>
    %13 = vector.shape_cast %12 : vector<32xf32> to vector<32x1xf32>
    %14 = arith.mulf %2, %2 : vector<32x64xf32>
    %cst_22 = arith.constant dense<0.000000e+00> : vector<32xf32>
    %15 = vector.multi_reduction <add>, %14, %cst_22 [1] : vector<32x64xf32> to vector<32xf32>
    %16 = vector.shape_cast %15 : vector<32xf32> to vector<32x1xf32>
    %cst_23 = arith.constant dense<0.000000e+00> : vector<32xf32>
    %17 = vector.multi_reduction <add>, %5, %cst_23 [1] : vector<32x64xf32> to vector<32xf32>
    %18 = vector.shape_cast %17 : vector<32xf32> to vector<32x1xf32>
    %19 = arith.addf %13, %18 : vector<32x1xf32>
    %20 = arith.mulf %5, %5 : vector<32x64xf32>
    %cst_24 = arith.constant dense<0.000000e+00> : vector<32xf32>
    %21 = vector.multi_reduction <add>, %20, %cst_24 [1] : vector<32x64xf32> to vector<32xf32>
    %22 = vector.shape_cast %21 : vector<32xf32> to vector<32x1xf32>
    %23 = arith.addf %16, %22 : vector<32x1xf32>
    %cst_25 = arith.constant dense<0.000000e+00> : vector<32xf32>
    %24 = vector.multi_reduction <add>, %8, %cst_25 [1] : vector<32x64xf32> to vector<32xf32>
    %25 = vector.shape_cast %24 : vector<32xf32> to vector<32x1xf32>
    %26 = arith.addf %19, %25 : vector<32x1xf32>
    %27 = arith.mulf %8, %8 : vector<32x64xf32>
    %cst_26 = arith.constant dense<0.000000e+00> : vector<32xf32>
    %28 = vector.multi_reduction <add>, %27, %cst_26 [1] : vector<32x64xf32> to vector<32xf32>
    %29 = vector.shape_cast %28 : vector<32xf32> to vector<32x1xf32>
    %30 = arith.addf %23, %29 : vector<32x1xf32>
    %cst_27 = arith.constant dense<0.000000e+00> : vector<32xf32>
    %31 = vector.multi_reduction <add>, %11, %cst_27 [1] : vector<32x64xf32> to vector<32xf32>
    %32 = vector.shape_cast %31 : vector<32xf32> to vector<32x1xf32>
    %33 = arith.addf %26, %32 : vector<32x1xf32>
    %34 = arith.mulf %11, %11 : vector<32x64xf32>
    %cst_28 = arith.constant dense<0.000000e+00> : vector<32xf32>
    %35 = vector.multi_reduction <add>, %34, %cst_28 [1] : vector<32x64xf32> to vector<32xf32>
    %36 = vector.shape_cast %35 : vector<32xf32> to vector<32x1xf32>
    %37 = arith.addf %30, %36 : vector<32x1xf32>
    %cst_29 = arith.constant 3.906250e-03 : f32
    %38 = vector.broadcast %cst_29 : f32 to vector<32x1xf32>
    %39 = arith.mulf %33, %38 : vector<32x1xf32>
    %cst_30 = arith.constant 3.906250e-03 : f32
    %40 = vector.broadcast %cst_30 : f32 to vector<32x1xf32>
    %41 = arith.mulf %37, %40 : vector<32x1xf32>
    %42 = arith.mulf %39, %39 : vector<32x1xf32>
    %43 = arith.subf %41, %42 : vector<32x1xf32>
    %cst_31 = arith.constant 0.000000e+00 : f32
    %44 = vector.broadcast %cst_31 : f32 to vector<32x1xf32>
    %45 = arith.maximumf %43, %44 : vector<32x1xf32>
    %cst_32 = arith.constant 9.99999974E-6 : f32
    %46 = vector.broadcast %cst_32 : f32 to vector<32x1xf32>
    %47 = arith.addf %45, %46 : vector<32x1xf32>
    %48 = math.rsqrt %47 : vector<32x1xf32>
    %cst_33 = arith.constant 0.000000e+00 : f32
    %49 = vector.broadcast %cst_33 : f32 to vector<32x128xf32>
    %50 = vector.broadcast %39 : vector<32x1xf32> to vector<32x64xf32>
    %51 = arith.subf %2, %50 : vector<32x64xf32>
    %52 = vector.broadcast %48 : vector<32x1xf32> to vector<32x64xf32>
    %53 = arith.mulf %51, %52 : vector<32x64xf32>
    %c0_34 = arith.constant 0 : index
    %c0_35 = arith.constant 0 : index
    %54 = vector.load %arg2[%c0_34, %c0_35] : memref<4x64xf32, #tpu.memory_space<vmem>>, vector<1x64xf32>
    %55 = vector.shape_cast %54 : vector<1x64xf32> to vector<64xf32>
    %56 = vector.shape_cast %55 : vector<64xf32> to vector<1x64xf32>
    %57 = vector.broadcast %56 : vector<1x64xf32> to vector<32x64xf32>
    %58 = arith.mulf %53, %57 : vector<32x64xf32>
    %c0_36 = arith.constant 0 : index
    %c0_37 = arith.constant 0 : index
    %59 = vector.load %arg3[%c0_36, %c0_37] : memref<4x64xf32, #tpu.memory_space<vmem>>, vector<1x64xf32>
    %60 = vector.shape_cast %59 : vector<1x64xf32> to vector<64xf32>
    %61 = vector.shape_cast %60 : vector<64xf32> to vector<1x64xf32>
    %62 = vector.broadcast %61 : vector<1x64xf32> to vector<32x64xf32>
    %63 = arith.addf %58, %62 : vector<32x64xf32>
    %64 = arith.truncf %63 : vector<32x64xf32> to vector<32x64xbf16>
    %c0_38 = arith.constant 0 : index
    %c0_39 = arith.constant 0 : index
    %c0_40 = arith.constant 0 : index
    %65 = vector.load %arg4[%c0_38, %c0_39, %c0_40] : memref<4x64x128xbf16, #tpu.memory_space<vmem>>, vector<1x64x128xbf16>
    %66 = vector.shape_cast %65 : vector<1x64x128xbf16> to vector<64x128xbf16>
    %cst_41 = arith.constant dense<0.000000e+00> : vector<32x128xf32>
    %67 = tpu.matmul %64, %66, %cst_41 {dimension_numbers = #tpu.dot_dimension_numbers<[1], [0], [0], [1], [0, 0, 1, 1], [], []>} : vector<32x64xbf16>, vector<64x128xbf16>, vector<32x128xf32> -> vector<32x128xf32>
    %68 = arith.addf %49, %67 : vector<32x128xf32>
    %69 = vector.broadcast %39 : vector<32x1xf32> to vector<32x64xf32>
    %70 = arith.subf %5, %69 : vector<32x64xf32>
    %71 = vector.broadcast %48 : vector<32x1xf32> to vector<32x64xf32>
    %72 = arith.mulf %70, %71 : vector<32x64xf32>
    %c1_42 = arith.constant 1 : index
    %c0_43 = arith.constant 0 : index
    %73 = vector.load %arg2[%c1_42, %c0_43] : memref<4x64xf32, #tpu.memory_space<vmem>>, vector<1x64xf32>
    %74 = vector.shape_cast %73 : vector<1x64xf32> to vector<64xf32>
    %75 = vector.shape_cast %74 : vector<64xf32> to vector<1x64xf32>
    %76 = vector.broadcast %75 : vector<1x64xf32> to vector<32x64xf32>
    %77 = arith.mulf %72, %76 : vector<32x64xf32>
    %c1_44 = arith.constant 1 : index
    %c0_45 = arith.constant 0 : index
    %78 = vector.load %arg3[%c1_44, %c0_45] : memref<4x64xf32, #tpu.memory_space<vmem>>, vector<1x64xf32>
    %79 = vector.shape_cast %78 : vector<1x64xf32> to vector<64xf32>
    %80 = vector.shape_cast %79 : vector<64xf32> to vector<1x64xf32>
    %81 = vector.broadcast %80 : vector<1x64xf32> to vector<32x64xf32>
    %82 = arith.addf %77, %81 : vector<32x64xf32>
    %83 = arith.truncf %82 : vector<32x64xf32> to vector<32x64xbf16>
    %c1_46 = arith.constant 1 : index
    %c0_47 = arith.constant 0 : index
    %c0_48 = arith.constant 0 : index
    %84 = vector.load %arg4[%c1_46, %c0_47, %c0_48] : memref<4x64x128xbf16, #tpu.memory_space<vmem>>, vector<1x64x128xbf16>
    %85 = vector.shape_cast %84 : vector<1x64x128xbf16> to vector<64x128xbf16>
    %cst_49 = arith.constant dense<0.000000e+00> : vector<32x128xf32>
    %86 = tpu.matmul %83, %85, %cst_49 {dimension_numbers = #tpu.dot_dimension_numbers<[1], [0], [0], [1], [0, 0, 1, 1], [], []>} : vector<32x64xbf16>, vector<64x128xbf16>, vector<32x128xf32> -> vector<32x128xf32>
    %87 = arith.addf %68, %86 : vector<32x128xf32>
    %88 = vector.broadcast %39 : vector<32x1xf32> to vector<32x64xf32>
    %89 = arith.subf %8, %88 : vector<32x64xf32>
    %90 = vector.broadcast %48 : vector<32x1xf32> to vector<32x64xf32>
    %91 = arith.mulf %89, %90 : vector<32x64xf32>
    %c2 = arith.constant 2 : index
    %c0_50 = arith.constant 0 : index
    %92 = vector.load %arg2[%c2, %c0_50] : memref<4x64xf32, #tpu.memory_space<vmem>>, vector<1x64xf32>
    %93 = vector.shape_cast %92 : vector<1x64xf32> to vector<64xf32>
    %94 = vector.shape_cast %93 : vector<64xf32> to vector<1x64xf32>
    %95 = vector.broadcast %94 : vector<1x64xf32> to vector<32x64xf32>
    %96 = arith.mulf %91, %95 : vector<32x64xf32>
    %c2_51 = arith.constant 2 : index
    %c0_52 = arith.constant 0 : index
    %97 = vector.load %arg3[%c2_51, %c0_52] : memref<4x64xf32, #tpu.memory_space<vmem>>, vector<1x64xf32>
    %98 = vector.shape_cast %97 : vector<1x64xf32> to vector<64xf32>
    %99 = vector.shape_cast %98 : vector<64xf32> to vector<1x64xf32>
    %100 = vector.broadcast %99 : vector<1x64xf32> to vector<32x64xf32>
    %101 = arith.addf %96, %100 : vector<32x64xf32>
    %102 = arith.truncf %101 : vector<32x64xf32> to vector<32x64xbf16>
    %c2_53 = arith.constant 2 : index
    %c0_54 = arith.constant 0 : index
    %c0_55 = arith.constant 0 : index
    %103 = vector.load %arg4[%c2_53, %c0_54, %c0_55] : memref<4x64x128xbf16, #tpu.memory_space<vmem>>, vector<1x64x128xbf16>
    %104 = vector.shape_cast %103 : vector<1x64x128xbf16> to vector<64x128xbf16>
    %cst_56 = arith.constant dense<0.000000e+00> : vector<32x128xf32>
    %105 = tpu.matmul %102, %104, %cst_56 {dimension_numbers = #tpu.dot_dimension_numbers<[1], [0], [0], [1], [0, 0, 1, 1], [], []>} : vector<32x64xbf16>, vector<64x128xbf16>, vector<32x128xf32> -> vector<32x128xf32>
    %106 = arith.addf %87, %105 : vector<32x128xf32>
    %107 = vector.broadcast %39 : vector<32x1xf32> to vector<32x64xf32>
    %108 = arith.subf %11, %107 : vector<32x64xf32>
    %109 = vector.broadcast %48 : vector<32x1xf32> to vector<32x64xf32>
    %110 = arith.mulf %108, %109 : vector<32x64xf32>
    %c3 = arith.constant 3 : index
    %c0_57 = arith.constant 0 : index
    %111 = vector.load %arg2[%c3, %c0_57] : memref<4x64xf32, #tpu.memory_space<vmem>>, vector<1x64xf32>
    %112 = vector.shape_cast %111 : vector<1x64xf32> to vector<64xf32>
    %113 = vector.shape_cast %112 : vector<64xf32> to vector<1x64xf32>
    %114 = vector.broadcast %113 : vector<1x64xf32> to vector<32x64xf32>
    %115 = arith.mulf %110, %114 : vector<32x64xf32>
    %c3_58 = arith.constant 3 : index
    %c0_59 = arith.constant 0 : index
    %116 = vector.load %arg3[%c3_58, %c0_59] : memref<4x64xf32, #tpu.memory_space<vmem>>, vector<1x64xf32>
    %117 = vector.shape_cast %116 : vector<1x64xf32> to vector<64xf32>
    %118 = vector.shape_cast %117 : vector<64xf32> to vector<1x64xf32>
    %119 = vector.broadcast %118 : vector<1x64xf32> to vector<32x64xf32>
    %120 = arith.addf %115, %119 : vector<32x64xf32>
    %121 = arith.truncf %120 : vector<32x64xf32> to vector<32x64xbf16>
    %c3_60 = arith.constant 3 : index
    %c0_61 = arith.constant 0 : index
    %c0_62 = arith.constant 0 : index
    %122 = vector.load %arg4[%c3_60, %c0_61, %c0_62] : memref<4x64x128xbf16, #tpu.memory_space<vmem>>, vector<1x64x128xbf16>
    %123 = vector.shape_cast %122 : vector<1x64x128xbf16> to vector<64x128xbf16>
    %cst_63 = arith.constant dense<0.000000e+00> : vector<32x128xf32>
    %124 = tpu.matmul %121, %123, %cst_63 {dimension_numbers = #tpu.dot_dimension_numbers<[1], [0], [0], [1], [0, 0, 1, 1], [], []>} : vector<32x64xbf16>, vector<64x128xbf16>, vector<32x128xf32> -> vector<32x128xf32>
    %125 = arith.addf %106, %124 : vector<32x128xf32>
    %c0_64 = arith.constant 0 : index
    %c0_65 = arith.constant 0 : index
    %126 = vector.load %arg5[%c0_64, %c0_65] : memref<32x128xf32, #tpu.memory_space<vmem>>, vector<32x128xf32>
    tpu.vector_store %arg5[%c0_64, %c0_65], %125 {strides = array<i32>} : memref<32x128xf32, #tpu.memory_space<vmem>>, vector<32x128xf32>,
    return
  }
  func.func @transform_0(%arg0: i32) -> (i32, i32, i32, i32, i32, i32) {
    %c0_i32 = arith.constant 0 : i32
    %c0_i32_0 = arith.constant 0 : i32
    %c0_i32_1 = arith.constant 0 : i32
    %c0_i32_2 = arith.constant 0 : i32
    %c0_i32_3 = arith.constant 0 : i32
    %c0_i32_4 = arith.constant 0 : i32
    return %arg0, %c0_i32, %c0_i32_0, %c0_i32_1, %c0_i32_2, %c0_i32_3 : i32, i32, i32, i32, i32, i32
  }
  func.func @transform_1(%arg0: i32) -> (i32, i32) {
    %c0_i32 = arith.constant 0 : i32
    %c0_i32_0 = arith.constant 0 : i32
    %c0_i32_1 = arith.constant 0 : i32
    return %c0_i32, %c0_i32_0 : i32, i32
  }
  func.func @transform_2(%arg0: i32) -> (i32, i32) {
    %c0_i32 = arith.constant 0 : i32
    %c0_i32_0 = arith.constant 0 : i32
    %c0_i32_1 = arith.constant 0 : i32
    return %c0_i32, %c0_i32_0 : i32, i32
  }
  func.func @transform_3(%arg0: i32) -> (i32, i32, i32) {
    %c0_i32 = arith.constant 0 : i32
    %c0_i32_0 = arith.constant 0 : i32
    %c0_i32_1 = arith.constant 0 : i32
    %c0_i32_2 = arith.constant 0 : i32
    return %c0_i32, %c0_i32_0, %c0_i32_1 : i32, i32, i32
  }
  func.func @transform_4(%arg0: i32) -> (i32, i32) {
    %c0_i32 = arith.constant 0 : i32
    %c0_i32_0 = arith.constant 0 : i32
    return %arg0, %c0_i32 : i32, i32
  }
}

</mosaic_0001>

<bundles_post_ra>
// kernel: tpu_custom_call.1
= control target key start
LH: loop header
LB: loop body
LE: loop exit
PB: predicated region body
PF: predicated region fallthrough
CT: control target
= control target key end

     0   :  { %9 = vsyncpa [#allocation3], 0  ;;  %s1898_s0 = inlined_call_operand.hbm [shape: f32[4,2,2,2,8,64], index: 0, kind: input, shape index: {}]   ;;  %s1899_s1 = inlined_call_operand.hbm [shape: f32[4,64], index: 1, kind: input, shape index: {}]   ;;  %s1900_s2 = inlined_call_operand.hbm [shape: f32[4,64], index: 2, kind: input, shape index: {}]   ;;  %s1901_s3 = inlined_call_operand.hbm [shape: bf16[4,64,128], index: 3, kind: input, shape index: {}]   ;;  %s1902_s4 = inlined_call_operand.hbm [shape: f32[64,128], index: 4, kind: output, shape index: {}]  }
   0x1   :  { %11 = vsyncpa [#allocation3 + $0x1], 0 }
   0x2   :  { %12 = vsyncpa [#allocation6], 0 }
   0x3   :  { %13 = vsyncpa [#allocation9], 0 }
   0x4   :  { %14 = vsyncpa [#allocation4], 0 }
   0x5   :  { %16 = vsyncpa [#allocation4 + $0x1], 0  ;;  %s1498_s15 = smov 0   ;;  %s1500_s16 = smov 0  }
   0x6   :  { %s1502_s17 = smov 0   ;;  %s1504_s18 = smov 0  }
   0x7 LB: > { %s1519_s19 = sadd.s32 4294967295, %s1460_s18   ;;  %s1035_s20 = sadd.s32 4294967294, %s1460_s18   ;;  %s1460_s18 = sphi %s1504_s18, %s1926_s18   ;;  %s1456_s17 = sphi %s1502_s17, %s1925_s17   ;;  %s1452_s16 = sphi %s1500_s16, %s1924_s16   ;;  %s1448_s15 = sphi %s1498_s15, %s1923_s15  }
   0x8   : > { %p42_p0 = scmp.ne.s32.totalorder %s1452_s16, %s1448_s15  ;;  %p1903_p1 = scmp.eq.s32.totalorder %s1519_s19, 0 }
   0x9   : > { %p135_p3 = scmp.eq.s32.totalorder %s1035_s20, 1  ;;  %p1036_p5 = scmp.ge.s32.totalorder %s1460_s18, 1 }
   0xa   : > { %p1528_p4 = por %p1903_p1, %p42_p0  ;;  %p142_p7 = scmp.lt.s32.totalorder %s1460_s18, 3 }
   0xb   : > { %p1533_p6 = por %p135_p3, %p42_p0  ;;  %s1462_s24 = smov [#allocation5]  }
   0xc   : > { %s1907_s21 = scalar_select %p1528_p4, 1, 0 }
   0xd   : > { %s1908_s22 = scalar_select %p1533_p6, 1, 0 }
   0xe   : > { %p1538_p8 = pnand %p1036_p5, %p142_p7  ;;  %s155_s25 = sshll.u32 %s1462_s24, 4  ;;  %s156_s25 = int_to_ptr.vmem [resolvable:$true] %s155_s25 }
   0xf   : > { %s1463_s26 = smov [#allocation7]   ;;  %s1464_s29 = smov [#allocation8]  }
  0x10   : > { %s1909_s23 = scalar_select %p1538_p8, 1, 0 }
  0x11   : > { %p1191_p10 = pneg %p1538_p8  ;;  %s166_s27 = sshll.u32 %s1463_s26, 4  ;;  %s167_s27 = int_to_ptr.vmem [resolvable:$true] %s166_s27 }
  0x12   : > { %s176_s30 = sshll.u32 %s1464_s29, 4  ;;  %s1293_s5 = scalar_lea.vmem %s156_s25, 64  ;;  %s1551_s30 = int_to_ptr.vmem [resolvable:$true] %s176_s30 }
  0x13   : > { %p1547_p11 = pnand %p1191_p10, %p1903_p1  ;;  %p1294_p13 = scmp.ne.s32.totalorder %s156_s25, %s1293_s5 }
  0x14   : > { %p1301_p5 = scmp.lt.s32.totalorder %s156_s25, %s156_s25  ;;  %p1302_p7 = scmp.lt.s32.totalorder %s1293_s5, %s1293_s5 }
  0x15   : > { %p1284_p12 = pneg %p1547_p11 }
  0x16   : > { %p1303_p10 = por %p1302_p7, %p1301_p5 }
  0x17   : > { %p1296_p0 = pnand %p1294_p13, %p1284_p12 }
  0x19   : > { %p1297_p3 = pneg %p1296_p0 }
  0x1b   : > { %p1304_p9 = pnand %p1303_p10, %p1297_p3 }
  0x1d   : > { %1307 = shalt.err (!%p1304_p9)
}
  0x1e   : > { %1194 = dma.hbm_to_vmem [thread:$0]  (!%p1547_p11), %s1899_s1, 64, %s156_s25, [#allocation6]  }
  0x1f   : > { %s1319_s8 = scalar_lea.vmem %s167_s27, 64  ;;  %p1327_p13 = scmp.lt.s32.totalorder %s167_s27, %s167_s27 }
  0x20   : > { %p1320_p1 = scmp.ne.s32.totalorder %s167_s27, %s1319_s8  ;;  %p1328_p0 = scmp.lt.s32.totalorder %s1319_s8, %s1319_s8 }
  0x22   : > { %p1322_p2 = pnand %p1320_p1, %p1284_p12  ;;  %p1329_p4 = por %p1328_p0, %p1327_p13 }
  0x24   : > { %p1323_p6 = pneg %p1322_p2 }
  0x26   : > { %p1330_p8 = pnand %p1329_p4, %p1323_p6 }
  0x28   : > { %1333 = shalt.err (!%p1330_p8)
}
  0x29   : > { %1197 = dma.hbm_to_vmem [thread:$0]  (!%p1547_p11), %s1900_s2, 64, %s167_s27, [#allocation6]  }
  0x2a   : > { %s1345_s11 = scalar_lea.vmem %s1551_s30, 2048  ;;  %p1353_p3 = scmp.lt.s32.totalorder %s1551_s30, %s1551_s30 }
  0x2b   : > { %p1346_p9 = scmp.ne.s32.totalorder %s1551_s30, %s1345_s11  ;;  %p1354_p4 = scmp.lt.s32.totalorder %s1345_s11, %s1345_s11 }
  0x2d   : > { %p1348_p1 = pnand %p1346_p9, %p1284_p12  ;;  %p1355_p6 = por %p1354_p4, %p1353_p3 }
  0x2f   : > { %p1349_p2 = pneg %p1348_p1 }
  0x31   : > { %p1356_p8 = pnand %p1355_p6, %p1349_p2 }
  0x33   : > { %1359 = shalt.err (!%p1356_p8)
}
  0x34   : > { %s1465_s12 = smov 64   ;;  %s1466_s13 = smov 4  }
  0x35   : > { %1200 = dma.hbm_to_vmem [thread:$0]  (!%p1547_p11), %s1901_s3, 2048, %s1551_s30, [#allocation9], %s1465_s12, %s1465_s12, %s1466_s13  }
  0x36   : > { %s1585_s24 = sadd.s32 1, %s1460_s18   ;;  %s29_s26 = sadd.s32 1, %s1456_s17 }
  0x37   : > { %s26_s25 = ssub.s32 %s1460_s18, %s1585_s24  ;;  %p36_p5 = scmp.ne.s32.totalorder %s1456_s17, %s1452_s16 }
  0x38   : > { %p27_p12 = scmp.eq.s32.totalorder %s26_s25, 0  ;;  %p37_p7 = scmp.eq.s32.totalorder %s1460_s18, 0 }
  0x39   : > { %p1212_p10 = scmp.lt.s32.totalorder %s1460_s18, 2  ;;  %p1911_p0 = scmp.eq.s32.totalorder %s1519_s19, 1 }
  0x3a   : > { %s1595_s27 = scalar_select %p27_p12, %s1456_s17, %s29_s26  }
  0x3b   : > { %p38_p13 = por %p37_p7, %p36_p5  ;;  %p1599_p9 = por %p1911_p0, %p36_p5 }
  0x3c   : > { %s190_s28 = sand.u32 1, %s1456_s17   ;;  %s1101_s5 = sshll.u32 %s1460_s18, 11 }
  0x3d   : > { %s1912_s29 = scalar_select %p1599_p9, 1, 0 }
  0x3e   : > { %s1041_s30 = sshll.u32 %s190_s28, 7  ;;  %s1608_s8 = scalar_lea.hbm %s1898_s0, %s1101_s5 }
  0x3f   : > { %s194_s9 = scalar_lea.vmem [#allocation2], %s1041_s30  ;;  %p1610_p11 = pnand %p1212_p10, %p38_p13 }
  0x40   : > { %s202_s10 = sshll.u32 %s194_s9, 4  ;;  %s1616_s12 = scalar_lea.sflag [#allocation3], %s190_s28  ;;  %s1614_s10 = int_to_ptr.vmem [resolvable:$true] %s202_s10 }
  0x41   : > { %s1360_s13 = scalar_lea.hbm %s1608_s8, 2048  ;;  %p1362_p2 = pneg %p1610_p11 }
  0x42   : > { %p1361_p1 = scmp.ne.s32.totalorder %s1608_s8, %s1360_s13  ;;  %s1365_s25 = scalar_lea.hbm %s1898_s0, 4096 }
  0x43   : > { %p1366_p6 = scmp.lt.s32.totalorder %s1608_s8, %s1898_s0  ;;  %p1367_p8 = scmp.lt.s32.totalorder %s1365_s25, %s1360_s13 }
  0x44   : > { %p1363_p3 = pnand %p1362_p2, %p1361_p1 }
  0x45   : > { %p1368_p12 = por %p1367_p8, %p1366_p6 }
  0x46   : > { %p1364_p4 = pneg %p1363_p3 }
  0x48   : > { %p1369_p5 = pnand %p1368_p12, %p1364_p4 }
  0x4a   : > { %1372 = shalt.err (!%p1369_p5)
}
  0x4b   : > { %s1373_s28 = scalar_lea.vmem %s1614_s10, 2048  ;;  %s1467_s30 = smov [#allocation2]  }
  0x4c   : > { %p1374_p7 = scmp.ne.s32.totalorder %s1614_s10, %s1373_s28  ;;  %s1378_s6 = sshll.u32 %s1467_s30, 4  ;;  %s1379_s6 = int_to_ptr.vmem [resolvable:$false] %s1378_s6 }
  0x4d   : > { %s1380_s7 = scalar_lea.vmem %s1379_s6, 4096  ;;  %p1381_p0 = scmp.lt.s32.totalorder %s1614_s10, %s1379_s6 }
  0x4e   : > { %p1376_p10 = pnand %p1374_p7, %p1362_p2  ;;  %p1382_p1 = scmp.lt.s32.totalorder %s1380_s7, %s1373_s28 }
  0x50   : > { %p1377_p13 = pneg %p1376_p10  ;;  %p1383_p3 = por %p1382_p1, %p1381_p0 }
  0x52   : > { %p1384_p9 = pnand %p1383_p3, %p1377_p13 }
  0x54   : > { %1387 = shalt.err (!%p1384_p9)
}
  0x55   : > { %s1468_s9 = smov 128   ;;  %s1469_s13 = smov 8  }
  0x56   : > { %1204 = dma.hbm_to_vmem [thread:$0]  (!%p1610_p11), %s1608_s8, 2048, %s1614_s10, %s1616_s12, %s1468_s9, %s1468_s9, %s1469_s13  }
  0x57   : > { %p1914_p2 = scmp.ne.s32.totalorder %s1909_s23, 0 }
  0x58   : > { %s1640_s14 = sand.u32 (!%p1914_p2), 1, %s1452_s16   ;;  %p1915_p9 = scmp.ne.s32.totalorder (!%p1914_p2), %s1907_s21, 0 }
  0x59   : > { %214 = sbr.rel (%p1914_p2) target bundleno = 568 (0x238), region = 36  ;;  %s1046_s20 = sshll.u32 (!%p1914_p2), %s1640_s14, 7 }
  0x5a   : > { %s217_s25 = scalar_lea.sflag (!%p1914_p2), [#allocation3], %s1640_s14  ;;  %s1644_s26 = scalar_lea.vmem (!%p1914_p2), [#allocation2], %s1046_s20 }
  0x5e   : > { %1431 = dma.done.wait (%p1915_p9), %s217_s25, 2048  }
  0x5f   : > { %1433 = vsyncadd (%p1915_p9), %s217_s25, 4294965248  ;;  %p1916_p11 = scmp.eq.s32.totalorder %s1519_s19, 0 }
  0x61   : > { %1435 = dma.done.wait (%p1916_p11), [#allocation6], 128   ;;  %p1917_p4 = pmov %p1916_p11 }
  0x63   : > { %1437 = vsyncadd (%p1917_p4), [#allocation6], 4294967168  ;;  %p1918_p6 = pmov %p1917_p4 }
  0x64   : > { %p1919_p8 = pmov %p1917_p4 }
  0x65   : > { %1439 = dma.done.wait (%p1918_p6), [#allocation9], 2048  }
  0x66   : > { %1441 = vsyncadd (%p1919_p8), [#allocation9], 4294965248  ;;  %vm279_vm0 = vcmask 523264   ;;  %v1659_v0 = vld [vmem:[%s1644_s26 + $0x8] sm:$0xff]  ;;  %v1662_v1 = vld [vmem:[%s1644_s26] sm:$0xff]  ;;  %s1050_s21 = sshll.u32 %s1640_s14, 5 }
  0x67   : > { %v1665_v2 = vld [vmem:[%s1644_s26 + $0x18] sm:$0xff]  ;;  %v308_v3 = vsel %vm279_vm0, %v1659_v0, 0.0  ;;  %v280_v4 = vsel %vm279_vm0, %v1662_v1, 0.0  ;;  %v1672_v5 = vld [vmem:[%s1644_s26 + $0x10] sm:$0xff]  ;;  %v1682_v9 = vld [vmem:[%s1644_s26 + $0x40] sm:$0xff]  ;;  %v292_v15 = vmul.f32 %v1662_v1, %v1662_v1  ;;  %v324_v21 = vmul.f32 %v1659_v0, %v1659_v0  ;;  %s256_s23 = scalar_lea.vmem [#allocation10], %s1050_s21 }
  0x68   : > { %309 = vadd.xlane.f32.xlu1 %v308_v3  ;;  %281 = vadd.xlane.f32.xlu0 %v280_v4  ;;  %v311_v6 = vsel %vm279_vm0, %v1665_v2, 0.0  ;;  %v283_v7 = vsel %vm279_vm0, %v1672_v5, 0.0  ;;  %v1679_v8 = vld [vmem:[%s1644_s26 + $0x50] sm:$0xff]  ;;  %v286_v11 = vsel %vm279_vm0, %v1682_v9, 0.0  ;;  %v1689_v12 = vld [vmem:[%s1644_s26 + $0x58] sm:$0xff]  ;;  %v1692_v13 = vld [vmem:[%s1644_s26 + $0x48] sm:$0xff]  ;;  %v293_v14 = vmul.f32 %v1672_v5, %v1672_v5 }
  0x69   : > { %v289_v10 = vsel %vm279_vm0, %v1679_v8, 0.0  ;;  %v317_v16 = vsel %vm279_vm0, %v1689_v12, 0.0  ;;  %v314_v17 = vsel %vm279_vm0, %v1692_v13, 0.0  ;;  %v296_v19 = vsel %vm279_vm0, %v292_v15, 0.0  ;;  %v1711_v24 = vld [vmem:[%s1644_s26 + $0x30] sm:$0xff]  ;;  %v1714_v25 = vld [vmem:[%s1644_s26 + $0x20] sm:$0xff] }
  0x6a   : > { %v299_v18 = vsel %vm279_vm0, %v293_v14, 0.0  ;;  %v325_v20 = vmul.f32 %v1665_v2, %v1665_v2  ;;  %v328_v23 = vsel %vm279_vm0, %v324_v21, 0.0  ;;  %v347_v26 = vsel %vm279_vm0, %v1711_v24, 0.0  ;;  %v1733_v36 = vld [vmem:[%s1644_s26 + $0x70] sm:$0xff]  ;;  %v1736_v37 = vld [vmem:[%s1644_s26 + $0x60] sm:$0xff]  ;;  %v1749_v44 = vld [vmem:[%s1644_s26 + $0x38] sm:$0xff] }
  0x6b   : > { %v344_v27 = vsel %vm279_vm0, %v1714_v25, 0.0  ;;  %v295_v28 = vmul.f32 %v1679_v8, %v1679_v8  ;;  %v294_v29 = vmul.f32 %v1682_v9, %v1682_v9  ;;  %v327_v32 = vmul.f32 %v1689_v12, %v1689_v12  ;;  %v1752_v45 = vld [vmem:[%s1644_s26 + $0x28] sm:$0xff]  ;;  %v1765_v52 = vld [vmem:[%s1644_s26 + $0x78] sm:$0xff]  ;;  %v1258_v3 = vld [vmem:[#allocation8 + $0x38] sm:$0xff]   ;;  %s933_s8 = sshll.u32 %s256_s23, 4  ;;  %s1102_s10 = sshll.u32 %s1519_s19, 9  ;;  %s1850_s8 = int_to_ptr.vmem [resolvable:$true] %s933_s8 }
  0x6c   : > { %312 = vadd.xlane.f32.xlu1 %v311_v6  ;;  %284 = vadd.xlane.f32.xlu0 %v283_v7  ;;  %v331_v22 = vsel %vm279_vm0, %v325_v20, 0.0  ;;  %v326_v33 = vmul.f32 %v1692_v13, %v1692_v13  ;;  %v353_v38 = vsel %vm279_vm0, %v1733_v36, 0.0  ;;  %v350_v39 = vsel %vm279_vm0, %v1736_v37, 0.0  ;;  %v1768_v53 = vld [vmem:[%s1644_s26 + $0x68] sm:$0xff]  ;;  %v1259_v4 = vld [vmem:[#allocation8 + $0x18] sm:$0xff]   ;;  %v1260_v6 = vld [vmem:[#allocation8 + $0x30] sm:$0xff]   ;;  %s1855_s5 = scalar_lea.hbm %s1902_s4, %s1102_s10 }
  0x6d   : > { %v305_v30 = vsel %vm279_vm0, %v295_v28, 0.0  ;;  %v302_v31 = vsel %vm279_vm0, %v294_v29, 0.0  ;;  %v337_v34 = vsel %vm279_vm0, %v327_v32, 0.0  ;;  %v361_v40 = vmul.f32 %v1711_v24, %v1711_v24  ;;  %v1261_v7 = vld [vmem:[#allocation8 + $0x10] sm:$0xff]   ;;  %1127 = vmatprep.subr.bf16.mxu0 %v1258_v3  ;;  %1139 = vmatprep.subr.bf16.mxu1 %v1259_v4  ;;  %v1264_v14 = vld [vmem:[#allocation8 + $0x20] sm:$0xff]   ;;  %s920_s28 = scalar_lea.sflag [#allocation4], %s1640_s14 }
  0x6e   : > { %v334_v35 = vsel %vm279_vm0, %v326_v33, 0.0  ;;  %v360_v41 = vmul.f32 %v1714_v25, %v1714_v25  ;;  %v383_v46 = vsel %vm279_vm0, %v1749_v44, 0.0  ;;  %v380_v47 = vsel %vm279_vm0, %v1752_v45, 0.0  ;;  %1128 = vmatpush3.bf16.msra.mxu0 %v1258_v3  ;;  %1140 = vmatpush3.bf16.msra.mxu1 %v1259_v4  ;;  %v1265_v15 = vld [vmem:[#allocation8] sm:$0xff]   ;;  %s1388_s19 = scalar_lea.vmem %s1850_s8, 512  ;;  %p1920_p5 = scmp.ne.s32.totalorder %s1912_s29, 0 }
  0x6f   : > { %v367_v42 = vsel %vm279_vm0, %v361_v40, 0.0  ;;  %v363_v48 = vmul.f32 %v1733_v36, %v1733_v36  ;;  %v362_v49 = vmul.f32 %v1736_v37, %v1736_v37  ;;  %v389_v54 = vsel %vm279_vm0, %v1765_v52, 0.0  ;;  %1129 = vmatprep.subr.bf16.mxu0 %v1260_v6  ;;  %1141 = vmatprep.subr.bf16.mxu1 %v1261_v7  ;;  %p1389_p12 = scmp.ne.s32.totalorder %s1850_s8, %s1388_s19  ;;  %s1470_s30 = smov [#allocation10]  }
  0x70   : > { %290 = vadd.xlane.f32.xlu1 %v289_v10  ;;  %287 = vadd.xlane.f32.xlu0 %v286_v11  ;;  %v364_v43 = vsel %vm279_vm0, %v360_v41, 0.0  ;;  %v386_v55 = vsel %vm279_vm0, %v1768_v53, 0.0  ;;  %v397_v56 = vmul.f32 %v1749_v44, %v1749_v44  ;;  %v396_v57 = vmul.f32 %v1752_v45, %v1752_v45  ;;  %v1262_v10 = vld [vmem:[#allocation8 + $0x28] sm:$0xff]   ;;  %s1392_s6 = sshll.u32 %s1470_s30, 4  ;;  %s1393_s6 = int_to_ptr.vmem [resolvable:$false] %s1392_s6 }
  0x71   : > { %v373_v50 = vsel %vm279_vm0, %v363_v48, 0.0  ;;  %v370_v51 = vsel %vm279_vm0, %v362_v49, 0.0  ;;  %v399_v60 = vmul.f32 %v1765_v52, %v1765_v52  ;;  %v398_v61 = vmul.f32 %v1768_v53, %v1768_v53  ;;  %v1263_v11 = vld [vmem:[#allocation8 + $0x8] sm:$0xff]   ;;  %p1390_p7 = pnand %p1389_p12, %p1920_p5  ;;  %s1394_s7 = scalar_lea.vmem %s1393_s6, 1024 }
  0x72   : > { %v403_v58 = vsel %vm279_vm0, %v397_v56, 0.0  ;;  %v400_v59 = vsel %vm279_vm0, %v396_v57, 0.0  ;;  %1130 = vmatpush3.bf16.msra.mxu0 %v1260_v6  ;;  %1142 = vmatpush3.bf16.msra.mxu1 %v1261_v7  ;;  %p1395_p13 = scmp.lt.s32.totalorder %s1850_s8, %s1393_s6  ;;  %p1396_p0 = scmp.lt.s32.totalorder %s1394_s7, %s1388_s19 }
  0x73   : > { %v409_v62 = vsel %vm279_vm0, %v399_v60, 0.0  ;;  %v406_v63 = vsel %vm279_vm0, %v398_v61, 0.0  ;;  %1131 = vmatprep.subr.bf16.mxu0 %v1262_v10  ;;  %1143 = vmatprep.subr.bf16.mxu1 %v1263_v11  ;;  %p1391_p10 = pneg %p1390_p7 }
  0x74   : > { %318 = vadd.xlane.f32.xlu1 %v317_v16  ;;  %315 = vadd.xlane.f32.xlu0 %v314_v17  ;;  %v1786_v16 = vld [vmem:[#allocation8 + $0x58] sm:$0xff]   ;;  %p1397_p1 = por %p1396_p0, %p1395_p13 }
  0x75   : > { %v1788_v17 = vld [vmem:[#allocation8 + $0x78] sm:$0xff]  }
  0x76   : > { %1132 = vmatpush3.bf16.msra.mxu0 %v1262_v10  ;;  %1144 = vmatpush3.bf16.msra.mxu1 %v1263_v11  ;;  %p1398_p3 = pnand %p1397_p1, %p1391_p10 }
  0x77   : > { %1133 = vmatprep.subr.bf16.mxu0 %v1264_v14  ;;  %1145 = vmatprep.subr.bf16.mxu1 %v1265_v15 }
  0x78   : > { %300 = vadd.xlane.f32.xlu1 %v299_v18  ;;  %297 = vadd.xlane.f32.xlu0 %v296_v19 }
  0x7a   : > { %1134 = vmatpush3.bf16.msra.mxu0 %v1264_v14  ;;  %1146 = vmatpush3.bf16.msra.mxu1 %v1265_v15 }
  0x7b   : > { %1151 = vmatprep.subr.bf16.mxu0 %v1786_v16  ;;  %1163 = vmatprep.subr.bf16.mxu1 %v1788_v17 }
  0x7c   : > { %332 = vadd.xlane.f32.xlu1 %v331_v22  ;;  %329 = vadd.xlane.f32.xlu0 %v328_v23 }
  0x80   : > { %348 = vadd.xlane.f32.xlu1 %v347_v26  ;;  %345 = vadd.xlane.f32.xlu0 %v344_v27 }
  0x84   : > { %306 = vadd.xlane.f32.xlu1 %v305_v30  ;;  %303 = vadd.xlane.f32.xlu0 %v302_v31 }
  0x88   : > { %338 = vadd.xlane.f32.xlu1 %v337_v34  ;;  %335 = vadd.xlane.f32.xlu0 %v334_v35 }
  0x8c   : > { %354 = vadd.xlane.f32.xlu1 %v353_v38  ;;  %351 = vadd.xlane.f32.xlu0 %v350_v39 }
  0x90   : > { %368 = vadd.xlane.f32.xlu1 %v367_v42  ;;  %365 = vadd.xlane.f32.xlu0 %v364_v43 }
  0x94   : > { %384 = vadd.xlane.f32.xlu1 %v383_v46  ;;  %381 = vadd.xlane.f32.xlu0 %v380_v47 }
  0x98   : > { %374 = vadd.xlane.f32.xlu1 %v373_v50  ;;  %371 = vadd.xlane.f32.xlu0 %v370_v51 }
  0x9c   : > { %390 = vadd.xlane.f32.xlu1 %v389_v54  ;;  %387 = vadd.xlane.f32.xlu0 %v386_v55 }
  0xa0   : > { %404 = vadd.xlane.f32.xlu1 %v403_v58  ;;  %401 = vadd.xlane.f32.xlu0 %v400_v59 }
  0xa4   : > { %410 = vadd.xlane.f32.xlu1 %v409_v62  ;;  %407 = vadd.xlane.f32.xlu0 %v406_v63 }
  0xf1   : > { %v310_v18 = vpop.xlane.xlu1 %309  ;;  %v282_v19 = vpop.xlane.xlu0 %281 }
  0xf2   : > { %v320_v48 = vadd.f32 %v310_v18, %v282_v19 }
  0xf5   : > { %v313_v20 = vpop.xlane.xlu1 %312  ;;  %v285_v21 = vpop.xlane.xlu0 %284 }
  0xf6   : > { %v321_v49 = vadd.f32 %v313_v20, %v285_v21 }
  0xf9   : > { %v291_v22 = vpop.xlane.xlu1 %290  ;;  %v288_v23 = vpop.xlane.xlu0 %287 }
  0xfd   : > { %v319_v26 = vpop.xlane.xlu1 %318  ;;  %v316_v27 = vpop.xlane.xlu0 %315 }
  0xfe   : > { %v323_v54 = vadd.f32 %v319_v26, %v291_v22  ;;  %v322_v55 = vadd.f32 %v316_v27, %v288_v23 }
 0x101   : > { %v301_v28 = vpop.xlane.xlu1 %300  ;;  %v298_v29 = vpop.xlane.xlu0 %297 }
 0x105   : > { %v333_v30 = vpop.xlane.xlu1 %332  ;;  %v330_v31 = vpop.xlane.xlu0 %329 }
 0x106   : > { %v341_v6 = vadd.f32 %v333_v30, %v301_v28  ;;  %v340_v7 = vadd.f32 %v330_v31, %v298_v29 }
 0x109   : > { %v349_v32 = vpop.xlane.xlu1 %348  ;;  %v346_v33 = vpop.xlane.xlu0 %345 }
 0x10a   : > { %v357_v56 = vadd.f32 %v349_v32, %v321_v49  ;;  %v356_v57 = vadd.f32 %v346_v33, %v320_v48 }
 0x10d   : > { %v307_v34 = vpop.xlane.xlu1 %306  ;;  %v304_v35 = vpop.xlane.xlu0 %303 }
 0x111   : > { %v339_v38 = vpop.xlane.xlu1 %338  ;;  %v336_v39 = vpop.xlane.xlu0 %335 }
 0x112   : > { %v343_v18 = vadd.f32 %v339_v38, %v307_v34  ;;  %v342_v19 = vadd.f32 %v336_v39, %v304_v35 }
 0x115   : > { %v355_v40 = vpop.xlane.xlu1 %354  ;;  %v352_v41 = vpop.xlane.xlu0 %351 }
 0x116   : > { %v359_v58 = vadd.f32 %v355_v40, %v323_v54  ;;  %v358_v59 = vadd.f32 %v352_v41, %v322_v55 }
 0x119   : > { %v369_v42 = vpop.xlane.xlu1 %368  ;;  %v366_v43 = vpop.xlane.xlu0 %365 }
 0x11a   : > { %v377_v20 = vadd.f32 %v369_v42, %v341_v6  ;;  %v376_v21 = vadd.f32 %v366_v43, %v340_v7 }
 0x11d   : > { %v385_v46 = vpop.xlane.xlu1 %384  ;;  %v382_v47 = vpop.xlane.xlu0 %381 }
 0x11e   : > { %v393_v60 = vadd.f32 %v385_v46, %v357_v56  ;;  %v392_v61 = vadd.f32 %v382_v47, %v356_v57 }
 0x120   : > { %v417_v10 = vmul.f32 0.00390625, %v393_v60  ;;  %v1792_v11 = vmul.f32 0.00390625, %v392_v61 }
 0x121   : > { %v375_v50 = vpop.xlane.xlu1 %374  ;;  %v372_v51 = vpop.xlane.xlu0 %371 }
 0x122   : > { %v379_v26 = vadd.f32 %v375_v50, %v343_v18  ;;  %v378_v27 = vadd.f32 %v372_v51, %v342_v19  ;;  %v425_v40 = vmul.f32 %v417_v10, %v417_v10  ;;  %v424_v28 = vmul.f32 %v1792_v11, %v1792_v11 }
 0x123   : > { %v676_v60 = vsub.f32 %v1711_v24, %v417_v10  ;;  %v796_v61 = vsub.f32 %v1749_v44, %v417_v10  ;;  %v444_v6 = vsub.f32 %v1662_v1, %v1792_v11  ;;  %v445_v7 = vsub.f32 %v1672_v5, %v417_v10 }
 0x125   : > { %v391_v62 = vpop.xlane.xlu1 %390  ;;  %v388_v63 = vpop.xlane.xlu0 %387 }
 0x126   : > { %v395_v3 = vadd.f32 %v391_v62, %v359_v58  ;;  %v394_v4 = vadd.f32 %v388_v63, %v358_v59  ;;  %v675_v62 = vsub.f32 %v1714_v25, %v1792_v11  ;;  %v795_v63 = vsub.f32 %v1752_v45, %v1792_v11  ;;  %v1065_v45 = vld [vmem:[#allocation5 + $0x1] ss:$0 sm:$0xff] }
 0x128   : > { %v1794_v22 = vmul.f32 0.00390625, %v395_v3  ;;  %v1796_v23 = vmul.f32 0.00390625, %v394_v4  ;;  %v480_v3 = vsub.f32 %v1659_v0, %v1792_v11  ;;  %v481_v4 = vsub.f32 %v1665_v2, %v417_v10  ;;  %v1063_v2 = vld [vmem:[#allocation5] ss:$0 sm:$0xff] }
 0x129   : > { %v405_v14 = vpop.xlane.xlu1 %404  ;;  %v402_v15 = vpop.xlane.xlu0 %401 }
 0x12a   : > { %v413_v32 = vadd.f32 %v405_v14, %v377_v20  ;;  %v412_v33 = vadd.f32 %v402_v15, %v376_v21  ;;  %v427_v38 = vmul.f32 %v1794_v22, %v1794_v22  ;;  %v426_v39 = vmul.f32 %v1796_v23, %v1796_v23  ;;  %v1064_v21 = vld [vmem:[#allocation7] ss:$0 sm:$0xff] }
 0x12b   : > { %v447_v24 = vsub.f32 %v1679_v8, %v1794_v22  ;;  %v483_v25 = vsub.f32 %v1689_v12, %v1794_v22  ;;  %v446_v44 = vsub.f32 %v1682_v9, %v1796_v23  ;;  %v482_v0 = vsub.f32 %v1692_v13, %v1796_v23  ;;  %v1066_v8 = vld [vmem:[#allocation7 + $0x1] ss:$0 sm:$0xff] }
 0x12c   : > { %v421_v31 = vmul.f32 0.00390625, %v413_v32  ;;  %v420_v41 = vmul.f32 0.00390625, %v412_v33 }
 0x12d   : > { %v411_v29 = vpop.xlane.xlu1 %410  ;;  %v408_v30 = vpop.xlane.xlu0 %407 }
 0x12e   : > { %v415_v34 = vadd.f32 %v411_v29, %v379_v26  ;;  %v414_v35 = vadd.f32 %v408_v30, %v378_v27  ;;  %v429_v42 = vsub.f32 %v421_v31, %v425_v40  ;;  %v428_v43 = vsub.f32 %v420_v41, %v424_v28  ;;  %v1079_v31 = vld [vmem:[#allocation5 + $0x2] ss:$0 sm:$0xff] }
 0x130   : > { %v423_v46 = vmul.f32 0.00390625, %v415_v34  ;;  %v422_v47 = vmul.f32 0.00390625, %v414_v35  ;;  %v433_v48 = vmax.f32 %v429_v42, 0.0  ;;  %v432_v49 = vmax.f32 %v428_v43, 0.0 }
 0x132   : > { %v431_v50 = vsub.f32 %v423_v46, %v427_v38  ;;  %v430_v51 = vsub.f32 %v422_v47, %v426_v39  ;;  %v437_v54 = vadd.f32 1e-05, %v433_v48  ;;  %v436_v55 = vadd.f32 1e-05, %v432_v49  ;;  %v1080_v47 = vld [vmem:[#allocation7 + $0x2] ss:$0 sm:$0xff] }
 0x133   : > { %v1087_v48 = vld [vmem:[#allocation5 + $0x3] ss:$0 sm:$0xff] }
 0x134   : > { %v435_v56 = vmax.f32 %v431_v50, 0.0  ;;  %v434_v57 = vmax.f32 %v430_v51, 0.0  ;;  %1274 = vrsqrt.f32 %v437_v54 }
 0x135   : > { %1276 = vrsqrt.f32 %v436_v55 }
 0x136   : > { %v439_v58 = vadd.f32 1e-05, %v435_v56  ;;  %v438_v59 = vadd.f32 1e-05, %v434_v57 }
 0x138   : > { %1278 = vrsqrt.f32 %v439_v58 }
 0x139   : > { %1280 = vrsqrt.f32 %v438_v59  ;;  %v1088_v59 = vld [vmem:[#allocation7 + $0x3] ss:$0 sm:$0xff] }
 0x141   : > { %v1275_v14 = vpop.eup %1274 }
 0x142   : > { %v1277_v15 = vpop.eup %1276  ;;  %v485_v18 = vmul.f32 %v1275_v14, %v481_v4  ;;  %v449_v1 = vmul.f32 %v1275_v14, %v445_v7  ;;  %v680_v11 = vmul.f32 %v1275_v14, %v676_v60  ;;  %v800_v5 = vmul.f32 %v1275_v14, %v796_v61 }
 0x143   : > { %v484_v19 = vmul.f32 %v1277_v15, %v480_v3  ;;  %v448_v20 = vmul.f32 %v1277_v15, %v444_v6  ;;  %v679_v12 = vmul.f32 %v1277_v15, %v675_v62  ;;  %v799_v26 = vmul.f32 %v1277_v15, %v795_v63  ;;  %v1268_v6 = vld [vmem:[#allocation8 + $0x50] sm:$0xff]   ;;  %v1270_v15 = vld [vmem:[#allocation8 + $0x48] sm:$0xff]  }
 0x144   : > { %v494_v9 = vmul.f32 %v1065_v45, %v485_v18  ;;  %v458_v32 = vmul.f32 %v1063_v2, %v449_v1  ;;  %v689_v54 = vmul.f32 %v1079_v31, %v680_v11  ;;  %v809_v63 = vmul.f32 %v1087_v48, %v800_v5  ;;  %v1271_v18 = vld [vmem:[#allocation8 + $0x68] sm:$0xff]  }
 0x145   : > { %v1824_v10 = vpop.eup %1278  ;;  %v493_v40 = vmul.f32 %v1065_v45, %v484_v19  ;;  %v457_v28 = vmul.f32 %v1063_v2, %v448_v20  ;;  %v688_v51 = vmul.f32 %v1079_v31, %v679_v12  ;;  %v808_v62 = vmul.f32 %v1087_v48, %v799_v26 }
 0x146   : > { %v1281_v27 = vpop.eup %1280  ;;  %v487_v13 = vmul.f32 %v1824_v10, %v483_v25  ;;  %v451_v33 = vmul.f32 %v1824_v10, %v447_v24  ;;  %v503_v41 = vadd.f32 %v1066_v8, %v494_v9  ;;  %v467_v34 = vadd.f32 %v1064_v21, %v458_v32 }
 0x147   : > { %v486_v29 = vmul.f32 %v1281_v27, %v482_v0  ;;  %v450_v30 = vmul.f32 %v1281_v27, %v446_v44  ;;  %v502_v39 = vadd.f32 %v1066_v8, %v493_v40  ;;  %v466_v42 = vadd.f32 %v1064_v21, %v457_v28  ;;  %v1269_v44 = vld [vmem:[#allocation8 + $0x70] sm:$0xff]  }
 0x148   : > { %v496_v35 = vmul.f32 %v1065_v45, %v487_v13  ;;  %v460_v38 = vmul.f32 %v1063_v2, %v451_v33  ;;  %v697_v60 = vadd.f32 %v1080_v47, %v688_v51  ;;  %v698_v61 = vadd.f32 %v1080_v47, %v689_v54 }
 0x149   : > { %v495_v43 = vmul.f32 %v1065_v45, %v486_v29  ;;  %v459_v46 = vmul.f32 %v1063_v2, %v450_v30  ;;  %v506_v55 = vpack.c.bf16 %v503_v41, %v502_v39  ;;  %v470_v56 = vpack.c.bf16 %v467_v34, %v466_v42 }
 0x14a   : > { %v505_v49 = vadd.f32 %v1066_v8, %v496_v35  ;;  %v469_v50 = vadd.f32 %v1064_v21, %v460_v38  ;;  %v678_v7 = vsub.f32 %v1733_v36, %v1794_v22  ;;  %v677_v14 = vsub.f32 %v1736_v37, %v1796_v23 }
 0x14b   : > { %v504_v57 = vadd.f32 %v1066_v8, %v495_v43  ;;  %v468_v58 = vadd.f32 %v1064_v21, %v459_v46  ;;  %1135 = vmatprep.mubr.msk.bf16.mxu0 %vm279_vm0, %v506_v55  ;;  %1147 = vmatprep.mubr.msk.bf16.mxu1 %vm279_vm0, %v470_v56  ;;  %v817_v24 = vadd.f32 %v1088_v59, %v808_v62 }
 0x14c   : > { %v818_v25 = vadd.f32 %v1088_v59, %v809_v63  ;;  %v798_v0 = vsub.f32 %v1765_v52, %v1794_v22  ;;  %v797_v45 = vsub.f32 %v1768_v53, %v1796_v23  ;;  %v701_v2 = vpack.c.bf16 %v698_v61, %v697_v60  ;;  %v1273_v23 = vld [vmem:[#allocation8 + $0x60] sm:$0xff]  }
 0x14d   : > { %v507_v3 = vpack.c.bf16 %v505_v49, %v504_v57  ;;  %v471_v4 = vpack.c.bf16 %v469_v50, %v468_v58  ;;  %v681_v37 = vmul.f32 %v1281_v27, %v677_v14  ;;  %v682_v52 = vmul.f32 %v1824_v10, %v678_v7 }
 0x14e   : > { %v821_v36 = vpack.c.bf16 %v818_v25, %v817_v24  ;;  %v801_v22 = vmul.f32 %v1281_v27, %v797_v45  ;;  %v802_v53 = vmul.f32 %v1824_v10, %v798_v0 }
 0x14f   : > { %1136 = vmatmul.mubr.msk.bf16.vlgmr.msra.gmra.mxu0 %vm279_vm0, %v507_v3  ;;  %1148 = vmatmul.mubr.msk.bf16.vlgmr.msra.gmra.mxu1 %vm279_vm0, %v471_v4  ;;  %v691_v1 = vmul.f32 %v1079_v31, %v682_v52 }
 0x150   : > { %1152 = vmatpush3.bf16.msra.mxu0 %v1786_v16  ;;  %1164 = vmatpush3.bf16.msra.mxu1 %v1788_v17  ;;  %v690_v16 = vmul.f32 %v1079_v31, %v681_v37  ;;  %v1272_v17 = vld [vmem:[#allocation8 + $0x40] sm:$0xff]   ;;  %v810_v11 = vmul.f32 %v1087_v48, %v801_v22  ;;  %v811_v5 = vmul.f32 %v1087_v48, %v802_v53 }
 0x151   : > { %1159 = vmatprep.mubr.msk.bf16.mxu0 %vm279_vm0, %v701_v2  ;;  %1153 = vmatprep.subr.bf16.mxu0 %v1268_v6  ;;  %v700_v8 = vadd.f32 %v1080_v47, %v691_v1 }
 0x152   : > { %1171 = vmatprep.mubr.msk.bf16.mxu1 %vm279_vm0, %v821_v36  ;;  %1165 = vmatprep.subr.bf16.mxu1 %v1269_v44  ;;  %v699_v19 = vadd.f32 %v1080_v47, %v690_v16  ;;  %v819_v10 = vadd.f32 %v1088_v59, %v810_v11  ;;  %v820_v20 = vadd.f32 %v1088_v59, %v811_v5 }
 0x154   : > { %1154 = vmatpush3.bf16.msra.mxu0 %v1268_v6  ;;  %1166 = vmatpush3.bf16.msra.mxu1 %v1269_v44  ;;  %v702_v21 = vpack.c.bf16 %v700_v8, %v699_v19  ;;  %v822_v12 = vpack.c.bf16 %v820_v20, %v819_v10 }
 0x155   : > { %1155 = vmatprep.subr.bf16.mxu0 %v1270_v15  ;;  %1167 = vmatprep.subr.bf16.mxu1 %v1271_v18 }
 0x158   : > { %1156 = vmatpush3.bf16.msra.mxu0 %v1270_v15  ;;  %1168 = vmatpush3.bf16.msra.mxu1 %v1271_v18 }
 0x159   : > { %1157 = vmatprep.subr.bf16.mxu0 %v1272_v17  ;;  %1169 = vmatprep.subr.bf16.mxu1 %v1273_v23 }
 0x15c   : > { %1158 = vmatpush3.bf16.msra.mxu0 %v1272_v17  ;;  %1170 = vmatpush3.bf16.msra.mxu1 %v1273_v23 }
 0x15f   : > { %1160 = vmatmul.mubr.msk.bf16.vlgmr.msra.gmra.mxu0 %vm279_vm0, %v702_v21  ;;  %1172 = vmatmul.mubr.msk.bf16.vlgmr.msra.gmra.mxu1 %vm279_vm0, %v822_v12 }
 0x20f   : > { %v1137_v26 = vpop.f32.mrf.mxu0  ;;  %v1149_v27 = vpop.f32.mrf.mxu1 }
 0x210   : > { %v669_v29 = vadd.f32 %v1149_v27, %v1137_v26 }
 0x211   : > { %v581_v9 = vpop.f32.mrf.mxu0  ;;  %v660_v32 = vpop.f32.mrf.mxu1 }
 0x212   : > { %v661_v41 = vadd.f32 %v660_v32, %v581_v9 }
 0x213   : > { %v1138_v13 = vpop.f32.mrf.mxu0  ;;  %v1150_v33 = vpop.f32.mrf.mxu1 }
 0x214   : > { %v672_v39 = vadd.f32 %v1150_v33, %v1138_v13 }
 0x215   : > { %v584_v40 = vpop.f32.mrf.mxu0  ;;  %v663_v28 = vpop.f32.mrf.mxu1 }
 0x216   : > { %v664_v48 = vadd.f32 %v663_v28, %v584_v40 }
 0x21f   : > { %v1161_v30 = vpop.f32.mrf.mxu0  ;;  %v1173_v31 = vpop.f32.mrf.mxu1 }
 0x220   : > { %v793_v34 = vadd.f32 %v1161_v30, %v669_v29 }
 0x221   : > { %v776_v35 = vpop.f32.mrf.mxu0  ;;  %v896_v38 = vpop.f32.mrf.mxu1 }
 0x222   : > { %v913_v42 = vadd.f32 %v1173_v31, %v793_v34  ;;  %v791_v43 = vadd.f32 %v776_v35, %v661_v41 }
 0x223   : > { %v1162_v46 = vpop.f32.mrf.mxu0  ;;  %v1174_v47 = vpop.f32.mrf.mxu1 }
 0x224   : > { %917 = vst [vmem:[%s256_s23 + $0x10] sm:$0xff] %v913_v42  ;;  %v911_v49 = vadd.f32 %v896_v38, %v791_v43  ;;  %v794_v50 = vadd.f32 %v1162_v46, %v672_v39 }
 0x225   : > { %v779_v51 = vpop.f32.mrf.mxu0  ;;  %v899_v56 = vpop.f32.mrf.mxu1 }
 0x226   : > { %915 = vst [vmem:[%s256_s23] sm:$0xff] %v911_v49  ;;  %v914_v54 = vadd.f32 %v1174_v47, %v794_v50  ;;  %v792_v55 = vadd.f32 %v779_v51, %v664_v48 }
 0x228   : > { %918 = vst [vmem:[%s256_s23 + $0x18] sm:$0xff] %v914_v54  ;;  %v912_v57 = vadd.f32 %v899_v56, %v792_v55 }
 0x22a   : > { %916 = vst [vmem:[%s256_s23 + $0x8] sm:$0xff] %v912_v57 }
 0x22b   : > { %1401 = shalt.err (!%p1398_p3)
}
 0x22c   : > { %s1402_s9 = scalar_lea.hbm %s1855_s5, 512  ;;  %s1406_s25 = scalar_lea.hbm %s1902_s4, 1024 }
 0x22d   : > { %p1403_p2 = scmp.ne.s32.totalorder %s1855_s5, %s1402_s9  ;;  %p1407_p4 = scmp.lt.s32.totalorder %s1855_s5, %s1902_s4 }
 0x22e   : > { %p1408_p6 = scmp.lt.s32.totalorder %s1406_s25, %s1402_s9 }
 0x22f   : > { %p1404_p9 = pnand %p1403_p2, %p1920_p5 }
 0x230   : > { %p1409_p8 = por %p1408_p6, %p1407_p4 }
 0x231   : > { %p1405_p11 = pneg %p1404_p9 }
 0x233   : > { %p1410_p12 = pnand %p1409_p8, %p1405_p11 }
 0x235   : > { %1413 = shalt.err (!%p1410_p12)
}
 0x236   : > { %s1471_s23 = smov 128   ;;  %s1472_s10 = smov 8  }
 0x237   : > { %1189 = dma.vmem_to_hbm [thread:$0]  (%p1920_p5), %s1850_s8, 512, %s1855_s5, %s920_s28, %s1471_s23, %s1471_s23, %s1472_s10  }
 0x238 PF: > { %s948_s11 = sand.u32 1, %s1448_s15   ;;  %p1921_p7 = scmp.ne.s32.totalorder %s1908_s22, 0 }
 0x239   : > { %p1922_p10 = scmp.ge.s32.totalorder %s1460_s18, 2  ;;  %s949_s12 = scalar_lea.sflag [#allocation4], %s948_s11 }
 0x23b   : > { %p1206_p13 = pnand %p1922_p10, %p1921_p7 }
 0x23d   : > { %p1207_p0 = pneg %p1206_p13 }
 0x23f   : > { %1443 = dma.done.wait (%p1207_p0), %s949_s12, 512  }
 0x240   : > { %1445 = vsyncadd (%p1207_p0), %s949_s12, 4294966784  ;;  %p19_p1 = scmp.ge.s32.totalorder %s1585_s24, 4   ;;  %s1923_s15 = smov %s1452_s16 }
 0x241   : > { %s1924_s16 = smov %s1456_s17  ;;  %s1925_s17 = smov %s1595_s27 }
 0x242   : > { %s1926_s18 = smov %s1585_s24  ;;  %21 = sbr.rel (!%p19_p1) target bundleno = 7 (0x7), region = 99 }
 0x247   :  { %954 = vsyncpa [#allocation3], 1 }
 0x248   :  { %956 = vsyncpa [#allocation3 + $0x1], 1 }
 0x249   :  { %957 = vsyncpa [#allocation6], 1 }
 0x24a   :  { %958 = vsyncpa [#allocation9], 1 }
 0x24b   :  { %959 = vsyncpa [#allocation4], 1 }
 0x24c   :  { %961 = vsyncpa [#allocation4 + $0x1], 1 }

</bundles_post_ra>
